<compile_context>
chip_gen: v5e
topology: v5e:2x2
jax: 0.10.0
libtpu: 0.0.40
codegen_flags: <defaults>
</compile_context>

<pallas_src>
import jax
import jax.numpy as jnp
from jax import lax
from jax.experimental import pallas as pl
from jax.experimental.pallas import tpu as pltpu


def _sigmoid_f32(z):
    # sigmoid(z) = 0.5 + 0.5 * tanh(0.5 * z): one EUP transcendental, f32 path.
    return 0.5 + 0.5 * jnp.tanh(0.5 * z)


def _logreg_o1_kernel(x_ref, w_ref, o_ref, acc_ref):
    """output_size == 1 path: VPU multiply + XLU lane reduction (no MXU)."""
    k = pl.program_id(1)

    @pl.when(k == 0)
    def _():
        acc_ref[...] = jnp.zeros_like(acc_ref)

    # x_ref: (TB, TK), w_ref: (1, TK) broadcast over the batch tile.
    acc_ref[...] += jnp.sum(x_ref[...] * w_ref[...], axis=-1, keepdims=True)

    @pl.when(k == pl.num_programs(1) - 1)
    def _():
        o_ref[...] = _sigmoid_f32(acc_ref[...]).astype(o_ref.dtype)


def _logreg_mxu_kernel(x_ref, w_ref, o_ref, acc_ref):
    """output_size > 1 path: MXU matmul, contracting feature dims directly
    (no wrapper-side transpose of the (O, D) PyTorch-layout weight)."""
    k = pl.program_id(1)

    @pl.when(k == 0)
    def _():
        acc_ref[...] = jnp.zeros_like(acc_ref)

    acc_ref[...] += lax.dot_general(
        x_ref[...], w_ref[...],
        dimension_numbers=(((1,), (1,)), ((), ())),
        preferred_element_type=jnp.float32,
    )

    @pl.when(k == pl.num_programs(1) - 1)
    def _():
        o_ref[...] = _sigmoid_f32(acc_ref[...]).astype(o_ref.dtype)


def _largest_aligned_divisor(n, cap, align):
    """Largest d <= cap with n % d == 0 and d % align == 0; else full dim n."""
    d = (cap // align) * align
    while d >= align:
        if n % d == 0:
            return d
        d -= align
    return n


def renyi_logistic_regression(x, weight, *, tb_target=512, tk_target=512):
    """x: (B, input_size) f32; weight: (output_size, input_size) f32 (PyTorch layout)."""
    B, D = x.shape
    O, D2 = weight.shape
    assert D == D2, (D, D2)

    # Tile sizes: exact divisors so no K-padding garbage enters the reduction;
    # batch tiles aligned to 8 sublanes, K tiles aligned to 128 lanes when possible.
    TB = _largest_aligned_divisor(B, tb_target, 8)
    TK = _largest_aligned_divisor(D, tk_target, 128)
    grid = (B // TB, D // TK)

    x_spec = pl.BlockSpec((TB, TK), lambda i, k: (i, k))

    if O == 1:
        kernel = _logreg_o1_kernel
        w_spec = pl.BlockSpec((1, TK), lambda i, k: (0, k))
        out_spec = pl.BlockSpec((TB, 1), lambda i, k: (i, 0))
        acc_shape = pltpu.VMEM((TB, 1), jnp.float32)
    else:
        kernel = _logreg_mxu_kernel
        w_spec = pl.BlockSpec((O, TK), lambda i, k: (0, k))
        out_spec = pl.BlockSpec((TB, O), lambda i, k: (i, 0))
        acc_shape = pltpu.VMEM((TB, O), jnp.float32)

    return pl.pallas_call(
        kernel,
        out_shape=jax.ShapeDtypeStruct((B, O), jnp.float32),
        grid_spec=pltpu.PrefetchScalarGridSpec(
            num_scalar_prefetch=0,
            grid=grid,
            in_specs=[x_spec, w_spec],
            out_specs=out_spec,
            scratch_shapes=[acc_shape],
        ),
        compiler_params=pltpu.CompilerParams(
            # batch axis shardable across TensorCores (v7x megacore);
            # K is a reduction into the accumulator -> "arbitrary".
            dimension_semantics=("parallel", "arbitrary"),
        ),
    )(x, weight)


if __name__ == "__main__":
    key = jax.random.PRNGKey(0)
    k1, k2, k3 = jax.random.split(key, 3)

    batch = 8
    input_size = 32

    x = jax.random.normal(k1, (batch, input_size), dtype=jnp.float32)

    # 1) Module's deterministic init: torch.nn.init.zeros_(weight) -> all 0.5.
    w_zero = jnp.zeros((1, input_size), dtype=jnp.float32)
    out0 = jax.block_until_ready(renyi_logistic_regression(x, w_zero))
    ref0 = jax.nn.sigmoid(x @ w_zero.T)
    assert out0.shape == (batch, 1)
    assert jnp.allclose(out0, ref0, atol=1e-5), (out0, ref0)

    # 2) Random weight, output_size=1 (VPU reduction path) — catches layout bugs.
    w_rand1 = jax.random.normal(k2, (1, input_size), dtype=jnp.float32)
    out1 = jax.block_until_ready(renyi_logistic_regression(x, w_rand1))
    ref1 = jax.nn.sigmoid(x @ w_rand1.T)
    assert jnp.allclose(out1, ref1, atol=1e-5), (out1, ref1)

    # 3) Random weight, output_size=8 (MXU path, no wrapper transpose).
    w_rand8 = jax.random.normal(k3, (8, input_size), dtype=jnp.float32)
    out8 = jax.block_until_ready(renyi_logistic_regression(x, w_rand8))
    ref8 = jax.nn.sigmoid(x @ w_rand8.T)
    assert out8.shape == (batch, 8)
    assert jnp.allclose(out8, ref8, atol=1e-5), (out8, ref8)

    print("KERNEL_OK")
</pallas_src>

<mosaic_0001>
module attributes {stable_mosaic.version = 11 : i64} {
  func.func @_logreg_o1_kernel(%arg0: i32, %arg1: i32, %arg2: memref<8x32xf32, #tpu.memory_space<vmem>>, %arg3: memref<1x32xf32, #tpu.memory_space<vmem>>, %arg4: memref<8x1xf32, #tpu.memory_space<vmem>>, %arg5: memref<8x1xf32, #tpu.memory_space<vmem>>) attributes {dimension_semantics = [#tpu.dimension_semantics<parallel>, #tpu.dimension_semantics<arbitrary>], iteration_bounds = array<i64: 1, 1>, scalar_prefetch = 0 : i64, scratch_operands = 1 : i64, tpu.core_type = #tpu.core_type<tc>, window_params = [{transform_indices = @transform_0, window_bounds = array<i64: 8, 32>}, {transform_indices = @transform_1, window_bounds = array<i64: 1, 32>}, {transform_indices = @transform_2, window_bounds = array<i64: 8, 1>}]} {
    %c0_i32 = arith.constant 0 : i32
    %0 = arith.cmpi eq, %arg1, %c0_i32 : i32
    %1 = arith.extui %0 : i1 to i32
    %c0_i32_0 = arith.constant 0 : i32
    %2 = arith.cmpi ne, %1, %c0_i32_0 : i32
    scf.if %2 {
      %cst_10 = arith.constant 0.000000e+00 : f32
      %15 = vector.broadcast %cst_10 : f32 to vector<8x1xf32>
      %c0_11 = arith.constant 0 : index
      %c0_12 = arith.constant 0 : index
      %16 = vector.load %arg5[%c0_11, %c0_12] : memref<8x1xf32, #tpu.memory_space<vmem>>, vector<8x1xf32>
      tpu.vector_store %arg5[%c0_11, %c0_12], %15 {strides = array<i32>} : memref<8x1xf32, #tpu.memory_space<vmem>>, vector<8x1xf32>,
    } else {
    }
    %c0 = arith.constant 0 : index
    %c0_1 = arith.constant 0 : index
    %3 = vector.load %arg5[%c0, %c0_1] : memref<8x1xf32, #tpu.memory_space<vmem>>, vector<8x1xf32>
    %c0_2 = arith.constant 0 : index
    %c0_3 = arith.constant 0 : index
    %4 = vector.load %arg2[%c0_2, %c0_3] : memref<8x32xf32, #tpu.memory_space<vmem>>, vector<8x32xf32>
    %c0_4 = arith.constant 0 : index
    %c0_5 = arith.constant 0 : index
    %5 = vector.load %arg3[%c0_4, %c0_5] : memref<1x32xf32, #tpu.memory_space<vmem>>, vector<1x32xf32>
    %6 = vector.broadcast %5 : vector<1x32xf32> to vector<8x32xf32>
    %7 = arith.mulf %4, %6 : vector<8x32xf32>
    %cst = arith.constant dense<0.000000e+00> : vector<8xf32>
    %8 = vector.multi_reduction <add>, %7, %cst [1] : vector<8x32xf32> to vector<8xf32>
    %9 = vector.shape_cast %8 : vector<8xf32> to vector<8x1xf32>
    %10 = arith.addf %3, %9 : vector<8x1xf32>
    %c0_6 = arith.constant 0 : index
    %c0_7 = arith.constant 0 : index
    %11 = vector.load %arg5[%c0_6, %c0_7] : memref<8x1xf32, #tpu.memory_space<vmem>>, vector<8x1xf32>
    tpu.vector_store %arg5[%c0_6, %c0_7], %10 {strides = array<i32>} : memref<8x1xf32, #tpu.memory_space<vmem>>, vector<8x1xf32>,
    %c0_i32_8 = arith.constant 0 : i32
    %12 = arith.cmpi eq, %arg1, %c0_i32_8 : i32
    %13 = arith.extui %12 : i1 to i32
    %c0_i32_9 = arith.constant 0 : i32
    %14 = arith.cmpi ne, %13, %c0_i32_9 : i32
    scf.if %14 {
      %c0_10 = arith.constant 0 : index
      %c0_11 = arith.constant 0 : index
      %15 = vector.load %arg5[%c0_10, %c0_11] : memref<8x1xf32, #tpu.memory_space<vmem>>, vector<8x1xf32>
      %cst_12 = arith.constant 5.000000e-01 : f32
      %16 = vector.broadcast %cst_12 : f32 to vector<8x1xf32>
      %17 = arith.mulf %16, %15 : vector<8x1xf32>
      %18 = math.tanh %17 : vector<8x1xf32>
      %cst_13 = arith.constant 5.000000e-01 : f32
      %19 = vector.broadcast %cst_13 : f32 to vector<8x1xf32>
      %20 = arith.mulf %19, %18 : vector<8x1xf32>
      %cst_14 = arith.constant 5.000000e-01 : f32
      %21 = vector.broadcast %cst_14 : f32 to vector<8x1xf32>
      %22 = arith.addf %21, %20 : vector<8x1xf32>
      %c0_15 = arith.constant 0 : index
      %c0_16 = arith.constant 0 : index
      %23 = vector.load %arg4[%c0_15, %c0_16] : memref<8x1xf32, #tpu.memory_space<vmem>>, vector<8x1xf32>
      tpu.vector_store %arg4[%c0_15, %c0_16], %22 {strides = array<i32>} : memref<8x1xf32, #tpu.memory_space<vmem>>, vector<8x1xf32>,
    } else {
    }
    return
  }
  func.func @transform_0(%arg0: i32, %arg1: i32) -> (i32, i32) {
    %c0_i32 = arith.constant 0 : i32
    return %arg0, %arg1 : i32, i32
  }
  func.func @transform_1(%arg0: i32, %arg1: i32) -> (i32, i32) {
    %c0_i32 = arith.constant 0 : i32
    %c0_i32_0 = arith.constant 0 : i32
    return %c0_i32, %arg1 : i32, i32
  }
  func.func @transform_2(%arg0: i32, %arg1: i32) -> (i32, i32) {
    %c0_i32 = arith.constant 0 : i32
    %c0_i32_0 = arith.constant 0 : i32
    return %arg0, %c0_i32 : i32, i32
  }
}

</mosaic_0001>

<bundles_post_ra>
// kernel: tpu_custom_call.1
= control target key start
LH: loop header
LB: loop body
LE: loop exit
PB: predicated region body
PF: predicated region fallthrough
CT: control target
= control target key end

     0   :  { %7 = vsyncpa [#allocation4], 0  ;;  %s162_s0 = inlined_call_operand.hbm [shape: f32[8,32], index: 0, kind: input, shape index: {}]   ;;  %s163_s1 = inlined_call_operand.hbm [shape: f32[1,32], index: 1, kind: input, shape index: {}]   ;;  %s164_s2 = inlined_call_operand.vmem [shape: f32[8,1], index: 2, kind: output, shape index: {}]  }
   0x1   :  { %s14_s11 = sshll.u32 %s162_s0, 4  ;;  %s15_s11 = int_to_ptr.hbm [resolvable:$true] %s14_s11 }
   0x2   :  { %8 = vsyncpa [#allocation6], 0  ;;  %s132_s12 = smov [#allocation3]   ;;  %s25_s16 = sshll.u32 %s163_s1, 4  ;;  %s26_s16 = int_to_ptr.hbm [resolvable:$true] %s25_s16 }
   0x3   :  { %s16_s13 = sshll.u32 %s132_s12, 4  ;;  %s133_s17 = smov [#allocation5]   ;;  %s17_s13 = int_to_ptr.vmem [resolvable:$true] %s16_s13 }
   0x4   :  { %19 = dma.hbm_to_vmem [thread:$0]  %s15_s11, 128, %s17_s13, [#allocation4]  }
   0x5   :  { %s27_s18 = sshll.u32 %s133_s17, 4  ;;  %s28_s18 = int_to_ptr.vmem [resolvable:$true] %s27_s18 }
   0x6   :  { %30 = dma.hbm_to_vmem [thread:$0]  %s26_s16, 16, %s28_s18, [#allocation6]  }
   0x7   :  { %128 = dma.done.wait [#allocation4], 128  }
   0x8   :  { %129 = vsyncadd [#allocation4], 4294967168 }
   0x9   :  { %130 = dma.done.wait [#allocation6], 16  }
   0xa   :  { %131 = vsyncadd [#allocation6], 4294967280  ;;  %vm43_vm0 = vcmask 7168   ;;  %v134_v0 = vmov 0.0   ;;  %v46_v1 = vld [vmem:[#allocation3] sm:$0xff]  ;;  %vm52_vm1 = vcmask 261120  }
   0xb   :  { %44 = vst.msk [vmem:[#allocation2] sm:$0xff] %vm43_vm0, %v134_v0  ;;  %v77_v2 = vld [vmem:[#allocation5] ss:$0 sm:$0xff] }
   0xc   :  { %v51_v3 = vmul.f32 %v77_v2, %v46_v1 }
   0xe   :  { %v53_v4 = vsel %vm52_vm1, %v51_v3, 0.0 }
   0xf   :  { %54 = vadd.xlane.f32.xlu0 %v53_v4 }
  0x12   :  { %v45_v5 = vld [vmem:[#allocation2] sm:$0xff] }
  0x82   :  { %v55_v6 = vpop.xlane.xlu0 %54 }
  0x83   :  { %v56_v7 = vadd.f32 %v55_v6, %v45_v5 }
  0x85   :  { %58 = vst.msk [vmem:[#allocation2] sm:$0xff] %vm43_vm0, %v56_v7 }
  0x8c   :  { %v62_v8 = vld [vmem:[#allocation2] sm:$0xff] }
  0x8d   :  { %v63_v9 = vmul.f32 0.5, %v62_v8 }
  0x8f   :  { %78 = vtanh.f32 %v63_v9 }
  0x95   :  { %v79_v10 = vpop.eup %78 }
  0x96   :  { %v65_v11 = vmul.f32 0.5, %v79_v10 }
  0x98   :  { %v66_v12 = vadd.f32 0.5, %v65_v11 }
  0x9a   :  { %67 = vst.msk [vmem:[%s164_s2] sm:$0xff] %vm43_vm0, %v66_v12 }
  0x9b   :  { %72 = vsyncpa [#allocation4], 1 }
  0x9c   :  { %73 = vsyncpa [#allocation6], 1 }

</bundles_post_ra>
